<compile_context>
chip_gen: v7x
topology: tpu7x:2x2x1
jax: 0.10.0
libtpu: 0.0.40
codegen_flags: <defaults>
</compile_context>

<pallas_src>
import functools

import jax
import jax.numpy as jnp
from jax import lax
from jax.experimental import pallas as pl
from jax.experimental.pallas import tpu as pltpu


def _center_loss_kernel(xT_ref, labels_ref, centersT_ref, out_ref, *,
                        num_classes, total_cols, mask_tail):
    # xT_ref:       (F, TB)  f32 VMEM  batch tile, batch on the lane axis
    # labels_ref:   (1, TB)  i32 VMEM  labels tile, lane-dense
    # centersT_ref: (F, C)   f32 VMEM  centers (transposed), resident across grid
    # out_ref:      (8, 128) f32 VMEM  accumulator block (scalar lives at [0, 0])
    i = pl.program_id(0)

    @pl.when(i == 0)
    def _init():
        out_ref[...] = jnp.zeros_like(out_ref)

    xT = xT_ref[...]                       # (F, TB)
    labels = labels_ref[...]               # (1, TB)
    centersT = centersT_ref[...]           # (F, C)
    tb = xT.shape[1]

    # Gather centers[:, labels] on the VPU: C is tiny, so an unrolled
    # compare+select per class beats a padded one-hot MXU matmul.  For large C
    # switch to a one-hot MXU matmul (C, F >= ~128) or a scalar-prefetch /
    # data-dependent gather so only the needed rows move.
    coords = jnp.zeros_like(xT)
    for c in range(num_classes):
        col = centersT[:, c:c + 1]                      # (F, 1)
        coords = jnp.where(labels == c, col, coords)    # broadcast -> (F, TB)

    diff = xT - coords
    sq = diff * diff

    if mask_tail:
        # Mask lanes past the true batch size (last tile may be block-padded).
        col_idx = i * tb + lax.broadcasted_iota(jnp.int32, (1, tb), 1)
        sq = jnp.where(col_idx < total_cols, sq, 0.0)

    partial = jnp.sum(sq)

    # Lane-dense (8, 128) accumulator: exact scalar at [0, 0], zeros elsewhere.
    sub = lax.broadcasted_iota(jnp.int32, (8, 128), 0)
    lane = lax.broadcasted_iota(jnp.int32, (8, 128), 1)
    out_ref[...] += jnp.where((sub == 0) & (lane == 0), partial, 0.0)


def center_loss(x, labels, centers, *, block_b=4096):
    """Pallas CenterLoss forward: sum((x - centers[labels])**2) / batch / 2."""
    B, F = x.shape
    C, Fc = centers.shape
    assert F == Fc, (F, Fc)

    x = x.astype(jnp.float32)
    centers = centers.astype(jnp.float32)

    # Lane-dense layout: batch on the 128-lane axis, features on sublanes.
    xT = x.T                                   # (F, B)
    centersT = centers.T                       # (F, C)
    labels2d = labels.reshape(1, B).astype(jnp.int32)

    # Tile the batch (lane axis) only when it is actually big; a single grid
    # step (block == full array) is the fast path for small B.
    if block_b >= B:
        tb = B
    else:
        tb = max(128, (block_b // 128) * 128)  # lane-aligned batch tile
    grid = pl.cdiv(B, tb)

    kernel = functools.partial(
        _center_loss_kernel,
        num_classes=C,
        total_cols=B,
        mask_tail=(B % tb != 0),
    )

    out = pl.pallas_call(
        kernel,
        out_shape=jax.ShapeDtypeStruct((8, 128), jnp.float32),
        grid=(grid,),
        in_specs=[
            pl.BlockSpec((F, tb), lambda i: (0, i)),   # x^T: batch tiled on lanes
            pl.BlockSpec((1, tb), lambda i: (0, i)),   # labels: lane-dense tile
            pl.BlockSpec((F, C), lambda i: (0, 0)),    # centers^T: VMEM-resident
        ],
        # Accumulator block carried across the batch axis.
        out_specs=pl.BlockSpec((8, 128), lambda i: (0, 0)),
        compiler_params=pltpu.CompilerParams(
            dimension_semantics=("arbitrary",),
            vmem_limit_bytes=32 * 1024 * 1024,
        ),
    )(xT, labels2d, centersT)

    # Single normalization outside the kernel.
    return out[0, 0] * (0.5 / B)


if __name__ == "__main__":
    num_classes = 10
    feat = 2
    batch = 100   # matches the module's batch_size

    key = jax.random.PRNGKey(0)
    k_centers, k_x, k_labels = jax.random.split(key, 3)

    # Deterministic parameter init (matches nn.Parameter(torch.randn(C, feat))).
    centers = jax.random.normal(k_centers, (num_classes, feat), dtype=jnp.float32)

    # Example inputs.
    x = jax.random.normal(k_x, (batch, feat), dtype=jnp.float32)
    labels = jax.random.randint(k_labels, (batch,), 0, num_classes, dtype=jnp.int32)

    # Default block_b >= B -> single grid step (no batch tiling overhead).
    loss = center_loss(x, labels, centers)
    jax.block_until_ready(loss)

    # Pure-JAX reference for sanity check.
    ref = jnp.sum((x - centers[labels]) ** 2) / batch / 2.0
    assert jnp.allclose(loss, ref, rtol=1e-5, atol=1e-5), (loss, ref)

    print("KERNEL_OK")
</pallas_src>

<mosaic_0001>
module attributes {stable_mosaic.version = 11 : i64} {
  func.func @_center_loss_kernel(%arg0: i32, %arg1: memref<2x100xf32, #tpu.memory_space<vmem>>, %arg2: memref<1x100xi32, #tpu.memory_space<vmem>>, %arg3: memref<2x10xf32, #tpu.memory_space<vmem>>, %arg4: memref<8x128xf32, #tpu.memory_space<vmem>>) attributes {dimension_semantics = [#tpu.dimension_semantics<arbitrary>], iteration_bounds = array<i64: 1>, scalar_prefetch = 0 : i64, scratch_operands = 0 : i64, tpu.core_type = #tpu.core_type<tc>, window_params = [{transform_indices = @transform_0, window_bounds = array<i64: 2, 100>}, {transform_indices = @transform_1, window_bounds = array<i64: 1, 100>}, {pipeline_mode = #tpu.pipeline_mode<synchronous>, transform_indices = @transform_2, window_bounds = array<i64: 2, 10>}, {pipeline_mode = #tpu.pipeline_mode<synchronous>, transform_indices = @transform_3, window_bounds = array<i64: 8, 128>}]} {
    %c0_i32 = arith.constant 0 : i32
    %0 = arith.cmpi eq, %arg0, %c0_i32 : i32
    %1 = arith.extui %0 : i1 to i32
    %c0_i32_0 = arith.constant 0 : i32
    %2 = arith.cmpi ne, %1, %c0_i32_0 : i32
    scf.if %2 {
      %cst_15 = arith.constant 0.000000e+00 : f32
      %106 = vector.broadcast %cst_15 : f32 to vector<8x128xf32>
      %c0_16 = arith.constant 0 : index
      %c0_17 = arith.constant 0 : index
      %107 = vector.load %arg4[%c0_16, %c0_17] : memref<8x128xf32, #tpu.memory_space<vmem>>, vector<8x128xf32>
      tpu.vector_store %arg4[%c0_16, %c0_17], %106 {strides = array<i32>} : memref<8x128xf32, #tpu.memory_space<vmem>>, vector<8x128xf32>,
    } else {
    }
    %c0 = arith.constant 0 : index
    %c0_1 = arith.constant 0 : index
    %3 = vector.load %arg1[%c0, %c0_1] : memref<2x100xf32, #tpu.memory_space<vmem>>, vector<2x100xf32>
    %c0_2 = arith.constant 0 : index
    %c0_3 = arith.constant 0 : index
    %4 = vector.load %arg2[%c0_2, %c0_3] : memref<1x100xi32, #tpu.memory_space<vmem>>, vector<1x100xi32>
    %c0_4 = arith.constant 0 : index
    %c0_5 = arith.constant 0 : index
    %5 = vector.load %arg3[%c0_4, %c0_5] : memref<2x10xf32, #tpu.memory_space<vmem>>, vector<2x10xf32>
    %cst = arith.constant 0.000000e+00 : f32
    %6 = vector.broadcast %cst : f32 to vector<2x100xf32>
    %7 = vector.extract_strided_slice %5 {offsets = [0, 0], sizes = [2, 1], strides = [1, 1]} : vector<2x10xf32> to vector<2x1xf32>
    %c0_i32_6 = arith.constant 0 : i32
    %8 = vector.broadcast %c0_i32_6 : i32 to vector<1x100xi32>
    %9 = arith.cmpi eq, %4, %8 : vector<1x100xi32>
    %10 = vector.shape_cast %9 : vector<1x100xi1> to vector<1x100xi1>
    %11 = vector.broadcast %10 : vector<1x100xi1> to vector<2x100xi1>
    %12 = vector.shape_cast %7 : vector<2x1xf32> to vector<2x1xf32>
    %13 = vector.broadcast %12 : vector<2x1xf32> to vector<2x100xf32>
    %14 = arith.select %11, %13, %6 : vector<2x100xi1>, vector<2x100xf32>
    %15 = vector.extract_strided_slice %5 {offsets = [0, 1], sizes = [2, 1], strides = [1, 1]} : vector<2x10xf32> to vector<2x1xf32>
    %c1_i32 = arith.constant 1 : i32
    %16 = vector.broadcast %c1_i32 : i32 to vector<1x100xi32>
    %17 = arith.cmpi eq, %4, %16 : vector<1x100xi32>
    %18 = vector.shape_cast %17 : vector<1x100xi1> to vector<1x100xi1>
    %19 = vector.broadcast %18 : vector<1x100xi1> to vector<2x100xi1>
    %20 = vector.shape_cast %15 : vector<2x1xf32> to vector<2x1xf32>
    %21 = vector.broadcast %20 : vector<2x1xf32> to vector<2x100xf32>
    %22 = arith.select %19, %21, %14 : vector<2x100xi1>, vector<2x100xf32>
    %23 = vector.extract_strided_slice %5 {offsets = [0, 2], sizes = [2, 1], strides = [1, 1]} : vector<2x10xf32> to vector<2x1xf32>
    %c2_i32 = arith.constant 2 : i32
    %24 = vector.broadcast %c2_i32 : i32 to vector<1x100xi32>
    %25 = arith.cmpi eq, %4, %24 : vector<1x100xi32>
    %26 = vector.shape_cast %25 : vector<1x100xi1> to vector<1x100xi1>
    %27 = vector.broadcast %26 : vector<1x100xi1> to vector<2x100xi1>
    %28 = vector.shape_cast %23 : vector<2x1xf32> to vector<2x1xf32>
    %29 = vector.broadcast %28 : vector<2x1xf32> to vector<2x100xf32>
    %30 = arith.select %27, %29, %22 : vector<2x100xi1>, vector<2x100xf32>
    %31 = vector.extract_strided_slice %5 {offsets = [0, 3], sizes = [2, 1], strides = [1, 1]} : vector<2x10xf32> to vector<2x1xf32>
    %c3_i32 = arith.constant 3 : i32
    %32 = vector.broadcast %c3_i32 : i32 to vector<1x100xi32>
    %33 = arith.cmpi eq, %4, %32 : vector<1x100xi32>
    %34 = vector.shape_cast %33 : vector<1x100xi1> to vector<1x100xi1>
    %35 = vector.broadcast %34 : vector<1x100xi1> to vector<2x100xi1>
    %36 = vector.shape_cast %31 : vector<2x1xf32> to vector<2x1xf32>
    %37 = vector.broadcast %36 : vector<2x1xf32> to vector<2x100xf32>
    %38 = arith.select %35, %37, %30 : vector<2x100xi1>, vector<2x100xf32>
    %39 = vector.extract_strided_slice %5 {offsets = [0, 4], sizes = [2, 1], strides = [1, 1]} : vector<2x10xf32> to vector<2x1xf32>
    %c4_i32 = arith.constant 4 : i32
    %40 = vector.broadcast %c4_i32 : i32 to vector<1x100xi32>
    %41 = arith.cmpi eq, %4, %40 : vector<1x100xi32>
    %42 = vector.shape_cast %41 : vector<1x100xi1> to vector<1x100xi1>
    %43 = vector.broadcast %42 : vector<1x100xi1> to vector<2x100xi1>
    %44 = vector.shape_cast %39 : vector<2x1xf32> to vector<2x1xf32>
    %45 = vector.broadcast %44 : vector<2x1xf32> to vector<2x100xf32>
    %46 = arith.select %43, %45, %38 : vector<2x100xi1>, vector<2x100xf32>
    %47 = vector.extract_strided_slice %5 {offsets = [0, 5], sizes = [2, 1], strides = [1, 1]} : vector<2x10xf32> to vector<2x1xf32>
    %c5_i32 = arith.constant 5 : i32
    %48 = vector.broadcast %c5_i32 : i32 to vector<1x100xi32>
    %49 = arith.cmpi eq, %4, %48 : vector<1x100xi32>
    %50 = vector.shape_cast %49 : vector<1x100xi1> to vector<1x100xi1>
    %51 = vector.broadcast %50 : vector<1x100xi1> to vector<2x100xi1>
    %52 = vector.shape_cast %47 : vector<2x1xf32> to vector<2x1xf32>
    %53 = vector.broadcast %52 : vector<2x1xf32> to vector<2x100xf32>
    %54 = arith.select %51, %53, %46 : vector<2x100xi1>, vector<2x100xf32>
    %55 = vector.extract_strided_slice %5 {offsets = [0, 6], sizes = [2, 1], strides = [1, 1]} : vector<2x10xf32> to vector<2x1xf32>
    %c6_i32 = arith.constant 6 : i32
    %56 = vector.broadcast %c6_i32 : i32 to vector<1x100xi32>
    %57 = arith.cmpi eq, %4, %56 : vector<1x100xi32>
    %58 = vector.shape_cast %57 : vector<1x100xi1> to vector<1x100xi1>
    %59 = vector.broadcast %58 : vector<1x100xi1> to vector<2x100xi1>
    %60 = vector.shape_cast %55 : vector<2x1xf32> to vector<2x1xf32>
    %61 = vector.broadcast %60 : vector<2x1xf32> to vector<2x100xf32>
    %62 = arith.select %59, %61, %54 : vector<2x100xi1>, vector<2x100xf32>
    %63 = vector.extract_strided_slice %5 {offsets = [0, 7], sizes = [2, 1], strides = [1, 1]} : vector<2x10xf32> to vector<2x1xf32>
    %c7_i32 = arith.constant 7 : i32
    %64 = vector.broadcast %c7_i32 : i32 to vector<1x100xi32>
    %65 = arith.cmpi eq, %4, %64 : vector<1x100xi32>
    %66 = vector.shape_cast %65 : vector<1x100xi1> to vector<1x100xi1>
    %67 = vector.broadcast %66 : vector<1x100xi1> to vector<2x100xi1>
    %68 = vector.shape_cast %63 : vector<2x1xf32> to vector<2x1xf32>
    %69 = vector.broadcast %68 : vector<2x1xf32> to vector<2x100xf32>
    %70 = arith.select %67, %69, %62 : vector<2x100xi1>, vector<2x100xf32>
    %71 = vector.extract_strided_slice %5 {offsets = [0, 8], sizes = [2, 1], strides = [1, 1]} : vector<2x10xf32> to vector<2x1xf32>
    %c8_i32 = arith.constant 8 : i32
    %72 = vector.broadcast %c8_i32 : i32 to vector<1x100xi32>
    %73 = arith.cmpi eq, %4, %72 : vector<1x100xi32>
    %74 = vector.shape_cast %73 : vector<1x100xi1> to vector<1x100xi1>
    %75 = vector.broadcast %74 : vector<1x100xi1> to vector<2x100xi1>
    %76 = vector.shape_cast %71 : vector<2x1xf32> to vector<2x1xf32>
    %77 = vector.broadcast %76 : vector<2x1xf32> to vector<2x100xf32>
    %78 = arith.select %75, %77, %70 : vector<2x100xi1>, vector<2x100xf32>
    %79 = vector.extract_strided_slice %5 {offsets = [0, 9], sizes = [2, 1], strides = [1, 1]} : vector<2x10xf32> to vector<2x1xf32>
    %c9_i32 = arith.constant 9 : i32
    %80 = vector.broadcast %c9_i32 : i32 to vector<1x100xi32>
    %81 = arith.cmpi eq, %4, %80 : vector<1x100xi32>
    %82 = vector.shape_cast %81 : vector<1x100xi1> to vector<1x100xi1>
    %83 = vector.broadcast %82 : vector<1x100xi1> to vector<2x100xi1>
    %84 = vector.shape_cast %79 : vector<2x1xf32> to vector<2x1xf32>
    %85 = vector.broadcast %84 : vector<2x1xf32> to vector<2x100xf32>
    %86 = arith.select %83, %85, %78 : vector<2x100xi1>, vector<2x100xf32>
    %87 = arith.subf %3, %86 : vector<2x100xf32>
    %88 = arith.mulf %87, %87 : vector<2x100xf32>
    %89 = vector.shape_cast %88 : vector<2x100xf32> to vector<1x2x100xf32>
    %cst_7 = arith.constant dense<0.000000e+00> : vector<1xf32>
    %90 = vector.multi_reduction <add>, %89, %cst_7 [1, 2] : vector<1x2x100xf32> to vector<1xf32>
    %91 = vector.shape_cast %90 : vector<1xf32> to vector<1x1x1xf32>
    %92 = vector.extract %91[0, 0, 0] : f32 from vector<1x1x1xf32>
    %93 = tpu.iota {dimensions = array<i32: 0>} : vector<8x128xi32>
    %94 = tpu.iota {dimensions = array<i32: 1>} : vector<8x128xi32>
    %c0_8 = arith.constant 0 : index
    %c0_9 = arith.constant 0 : index
    %95 = vector.load %arg4[%c0_8, %c0_9] : memref<8x128xf32, #tpu.memory_space<vmem>>, vector<8x128xf32>
    %c0_i32_10 = arith.constant 0 : i32
    %96 = vector.broadcast %c0_i32_10 : i32 to vector<8x128xi32>
    %97 = arith.cmpi eq, %93, %96 : vector<8x128xi32>
    %c0_i32_11 = arith.constant 0 : i32
    %98 = vector.broadcast %c0_i32_11 : i32 to vector<8x128xi32>
    %99 = arith.cmpi eq, %94, %98 : vector<8x128xi32>
    %100 = arith.andi %97, %99 : vector<8x128xi1>
    %cst_12 = arith.constant 0.000000e+00 : f32
    %101 = vector.broadcast %92 : f32 to vector<8x128xf32>
    %102 = vector.broadcast %cst_12 : f32 to vector<8x128xf32>
    %103 = arith.select %100, %101, %102 : vector<8x128xi1>, vector<8x128xf32>
    %104 = arith.addf %95, %103 : vector<8x128xf32>
    %c0_13 = arith.constant 0 : index
    %c0_14 = arith.constant 0 : index
    %105 = vector.load %arg4[%c0_13, %c0_14] : memref<8x128xf32, #tpu.memory_space<vmem>>, vector<8x128xf32>
    tpu.vector_store %arg4[%c0_13, %c0_14], %104 {strides = array<i32>} : memref<8x128xf32, #tpu.memory_space<vmem>>, vector<8x128xf32>,
    return
  }
  func.func @transform_0(%arg0: i32) -> (i32, i32) {
    %c0_i32 = arith.constant 0 : i32
    %c0_i32_0 = arith.constant 0 : i32
    return %c0_i32, %arg0 : i32, i32
  }
  func.func @transform_1(%arg0: i32) -> (i32, i32) {
    %c0_i32 = arith.constant 0 : i32
    %c0_i32_0 = arith.constant 0 : i32
    return %c0_i32, %arg0 : i32, i32
  }
  func.func @transform_2(%arg0: i32) -> (i32, i32) {
    %c0_i32 = arith.constant 0 : i32
    %c0_i32_0 = arith.constant 0 : i32
    %c0_i32_1 = arith.constant 0 : i32
    return %c0_i32, %c0_i32_0 : i32, i32
  }
  func.func @transform_3(%arg0: i32) -> (i32, i32) {
    %c0_i32 = arith.constant 0 : i32
    %c0_i32_0 = arith.constant 0 : i32
    %c0_i32_1 = arith.constant 0 : i32
    return %c0_i32, %c0_i32_0 : i32, i32
  }
}

</mosaic_0001>

<bundles_post_ra>
// kernel: tpu_custom_call.1
= control target key start
LH: loop header
LB: loop body
LE: loop exit
PB: predicated region body
PF: predicated region fallthrough
CT: control target
= control target key end

     0   :  { %8 = vsyncpa [#allocation3], 0  ;;  %s355_s0 = inlined_call_operand.hbm [shape: f32[2,100], index: 0, kind: input, shape index: {}]   ;;  %s356_s1 = inlined_call_operand.vmem [shape: s32[1,100], index: 1, kind: input, shape index: {}]   ;;  %s357_s2 = inlined_call_operand.vmem [shape: f32[2,10], index: 2, kind: input, shape index: {}]   ;;  %s358_s3 = inlined_call_operand.hbm [shape: f32[8,128], index: 3, kind: output, shape index: {}]  }
   0x1   :  { %9 = vsyncpa [#allocation4], 0  ;;  %s270_s12 = smov [#allocation2]   ;;  %s222_s16 = scalar_lea.hbm %s355_s0, 32 }
   0x2   :  { %s16_s13 = sshll.u32 %s270_s12, 4  ;;  %p223_p0 = scmp.ne.s32.totalorder %s355_s0, %s222_s16  ;;  %s17_s13 = int_to_ptr.vmem [resolvable:$true] %s16_s13 }
   0x3   :  { %p226_p1 = scmp.lt.u32.totalorder %s222_s16, %s355_s0 }
   0x5   :  { %p228_p2 = pnand %p226_p1, %p223_p0 }
   0x7   :  { %231 = shalt.err (!%p228_p2)
}
   0x8   :  { %s232_s21 = scalar_lea.vmem %s17_s13, 32  ;;  %p237_p4 = scmp.lt.s32.totalorder %s17_s13, %s17_s13 }
   0x9   :  { %p233_p3 = scmp.ne.s32.totalorder %s17_s13, %s232_s21  ;;  %p238_p5 = scmp.lt.s32.totalorder %s232_s21, %s232_s21 }
   0xb   :  { %p239_p6 = por %p238_p5, %p237_p4 }
   0xd   :  { %p240_p7 = pnand %p239_p6, %p233_p3 }
   0xf   :  { %243 = shalt.err (!%p240_p7)
}
  0x10   :  { %19 = dma.hbm_to_vmem [thread:$0]  %s355_s0, 32, %s17_s13, [#allocation3]  }
  0x11   :  { %266 = dma.done.wait [#allocation3], 32  }
  0x12   :  { %267 = vsyncadd [#allocation3], 4294967264  ;;  %v271_v0 = vmov 2   ;;  %v272_v1 = vmov 0   ;;  %v34_v2 = vld [vmem:[%s357_s2] sm:$0x3]  ;;  %v37_v11 = vlaneseq }
  0x13   :  { %213 = vset.pattern.permute.xlu1 %v271_v0  ;;  %211 = vset.pattern.permute.xlu0 %v272_v1  ;;  %v273_v3 = vmov 3   ;;  %v274_v4 = vmov 1   ;;  %v275_v5 = vmov 4   ;;  %v276_v6 = vmov 5   ;;  %v33_v12 = vld [vmem:[%s356_s1] sm:$0x1] }
  0x14   :  { %68 = vperm.xlu1 %213, %v34_v2   ;;  %44 = vperm.xlu0 %211, %v34_v2   ;;  %v277_v7 = vmov 6   ;;  %v278_v8 = vmov 8   ;;  %v279_v9 = vmov 7   ;;  %v280_v10 = vmov 9   ;;  %v32_v53 = vld [vmem:[#allocation2] sm:$0x3] }
  0x15   :  { %v322_v13 = vshrl.u32 %v37_v11, 7  ;;  %vm35_vm0 = vcmp.eq.s32.totalorder %v33_v12, 0  ;;  %vm48_vm1 = vcmp.eq.s32.totalorder %v33_v12, 1  ;;  %vm60_vm2 = vcmp.eq.s32.totalorder %v33_v12, 2  ;;  %s281_s26 = smov [#allocation5]  }
  0x16   :  { %v36_v15 = vsel %vm35_vm0, 1, %v272_v1  ;;  %v49_v18 = vsel %vm48_vm1, 1, %v272_v1  ;;  %v61_v21 = vsel %vm60_vm2, 1, %v272_v1  ;;  %vm72_vm3 = vcmp.eq.s32.totalorder %v33_v12, 3  ;;  %s187_s27 = sshll.u32 %s281_s26, 4  ;;  %s188_s27 = int_to_ptr.vmem [resolvable:$true] %s187_s27 }
  0x17   :  { %v39_v14 = vsub.s32 0, %v322_v13  ;;  %vm84_vm5 = vcmp.eq.s32.totalorder %v33_v12, 4  ;;  %v73_v24 = vsel %vm72_vm3, 1, %v272_v1  ;;  %vm96_vm7 = vcmp.eq.s32.totalorder %v33_v12, 5  ;;  %s244_s28 = scalar_lea.vmem %s188_s27, 128  ;;  %p249_p9 = scmp.lt.s32.totalorder %s188_s27, %s188_s27 }
  0x18   :  { %214 = vset.pattern.permute.xlu1 %v273_v3  ;;  %212 = vset.pattern.permute.xlu0 %v274_v4  ;;  %v85_v27 = vsel %vm84_vm5, 1, %v272_v1  ;;  %vm108_vm8 = vcmp.eq.s32.totalorder %v33_v12, 6  ;;  %vm120_vm9 = vcmp.eq.s32.totalorder %v33_v12, 7  ;;  %v97_v33 = vsel %vm96_vm7, 1, %v272_v1  ;;  %p245_p8 = scmp.ne.s32.totalorder %s188_s27, %s244_s28  ;;  %p250_p10 = scmp.lt.s32.totalorder %s244_s28, %s244_s28 }
  0x19   :  { %80 = vperm.xlu1 %214, %v34_v2   ;;  %56 = vperm.xlu0 %212, %v34_v2   ;;  %v40_v17 = vrot.slane %v36_v15, %v39_v14  ;;  %v53_v20 = vrot.slane %v49_v18, %v39_v14  ;;  %v65_v23 = vrot.slane %v61_v21, %v39_v14  ;;  %v109_v34 = vsel %vm108_vm8, 1, %v272_v1 }
  0x1a   :  { %v77_v28 = vrot.slane %v73_v24, %v39_v14  ;;  %v89_v32 = vrot.slane %v85_v27, %v39_v14  ;;  %v121_v35 = vsel %vm120_vm9, 1, %v272_v1  ;;  %vm132_vm11 = vcmp.eq.s32.totalorder %v33_v12, 8  ;;  %p251_p11 = por %p250_p10, %p249_p9 }
  0x1b   :  { %vm41_vm4 = vcmp.eq.s32.totalorder %v40_v17, 1  ;;  %vm54_vm6 = vcmp.eq.s32.totalorder %v53_v20, 1  ;;  %vm330_vm10 = vcmp.eq.s32.totalorder %v65_v23, 1  ;;  %v101_v37 = vrot.slane %v97_v33, %v39_v14 }
  0x1c   :  { %vm78_vm12 = vcmp.eq.s32.totalorder %v77_v28, 1  ;;  %vm144_vm13 = vcmp.eq.s32.totalorder %v33_v12, 9  ;;  %vm90_vm14 = vcmp.eq.s32.totalorder %v89_v32, 1  ;;  %v113_v38 = vrot.slane %v109_v34, %v39_v14  ;;  %p252_p12 = pnand %p251_p11, %p245_p8 }
  0x1d   :  { %215 = vset.pattern.permute.xlu1 %v275_v5  ;;  %216 = vset.pattern.permute.xlu0 %v276_v6  ;;  %v125_v40 = vrot.slane %v121_v35, %v39_v14  ;;  %v133_v41 = vsel %vm132_vm11, 1, %v272_v1  ;;  %v145_v43 = vsel %vm144_vm13, 1, %v272_v1  ;;  %vm102_vm15 = vcmp.eq.s32.totalorder %v101_v37, 1 }
  0x1e   :  { %92 = vperm.xlu1 %215, %v34_v2   ;;  %104 = vperm.xlu0 %216, %v34_v2   ;;  %vm114_vm0 = vcmp.eq.s32.totalorder %v113_v38, 1  ;;  %v137_v46 = vrot.slane %v133_v41, %v39_v14  ;;  %v149_v47 = vrot.slane %v145_v43, %v39_v14  ;;  %v172_v3 = vand.u32 127, %v37_v11 }
  0x1f   :  { %vm126_vm1 = vcmp.eq.s32.totalorder %v125_v40, 1  ;;  %vm174_vm5 = vcmp.eq.s32.totalorder %v322_v13, 0 }
  0x20   :  { %vm138_vm2 = vcmp.eq.s32.totalorder %v137_v46, 1  ;;  %vm150_vm3 = vcmp.eq.s32.totalorder %v149_v47, 1 }
  0x22   :  { %217 = vset.pattern.permute.xlu1 %v277_v7  ;;  %219 = vset.pattern.permute.xlu0 %v278_v8 }
  0x23   :  { %116 = vperm.xlu1 %217, %v34_v2   ;;  %140 = vperm.xlu0 %219, %v34_v2  }
  0x27   :  { %218 = vset.pattern.permute.xlu1 %v279_v9  ;;  %221 = vset.pattern.permute.xlu0 %v280_v10 }
  0x28   :  { %128 = vperm.xlu1 %218, %v34_v2  }
  0x2c   :  { %220 = vset.pattern.permute.xlu1 %v280_v10 }
  0x2d   :  { %152 = vperm.xlu1 %220, %v34_v2  }
  0x93   :  { %v69_v16 = vpop.permute.xlu1 %68  ;;  %v45_v19 = vpop.permute.xlu0 %44 }
  0x94   :  { %v47_v25 = vsel %vm41_vm4, %v45_v19, 0.0  ;;  %vm158_vm4 = vcmask 812032  }
  0x98   :  { %v81_v22 = vpop.permute.xlu1 %80  ;;  %v57_v26 = vpop.permute.xlu0 %56 }
  0x99   :  { %v59_v29 = vsel %vm54_vm6, %v57_v26, %v47_v25  ;;  %vm175_vm6 = vcmp.eq.s32.totalorder %v172_v3, 0 }
  0x9a   :  { %v71_v36 = vsel %vm330_vm10, %v69_v16, %v59_v29  ;;  %vm176_vm7 = vmand %vm174_vm5, %vm175_vm6 }
  0x9b   :  { %v83_v42 = vsel %vm78_vm12, %v81_v22, %v71_v36 }
  0x9d   :  { %v93_v31 = vpop.permute.xlu1 %92  ;;  %v105_v45 = vpop.permute.xlu0 %104 }
  0x9e   :  { %v95_v44 = vsel %vm90_vm14, %v93_v31, %v83_v42 }
  0x9f   :  { %v107_v48 = vsel %vm102_vm15, %v105_v45, %v95_v44 }
  0xa2   :  { %v117_v39 = vpop.permute.xlu1 %116  ;;  %v141_v52 = vpop.permute.xlu0 %140 }
  0xa3   :  { %v119_v50 = vsel %vm114_vm0, %v117_v39, %v107_v48 }
  0xa7   :  { %v129_v49 = vpop.permute.xlu1 %128 }
  0xa8   :  { %v131_v51 = vsel %vm126_vm1, %v129_v49, %v119_v50 }
  0xa9   :  { %v143_v54 = vsel %vm138_vm2, %v141_v52, %v131_v51 }
  0xac   :  { %v153_v55 = vpop.permute.xlu1 %152 }
  0xad   :  { %v155_v56 = vsel %vm150_vm3, %v153_v55, %v143_v54 }
  0xae   :  { %v156_v57 = vsub.f32 %v32_v53, %v155_v56 }
  0xb0   :  { %v157_v58 = vmul.f32 %v156_v57, %v156_v57 }
  0xb2   :  { %v159_v59 = vsel %vm158_vm4, %v157_v58, 0.0 }
  0xb3   :  { %160 = vadd.xlane.f32.xlu1 %v159_v59 }
 0x140   :  { %v161_v60 = vpop.xlane.xlu1 %160 }
 0x141   :  { %v162_v61 = vrot.slane %v161_v60, 4 }
 0x143   :  { %v163_v62 = vadd.f32 %v162_v61, %v161_v60 }
 0x145   :  { %v164_v63 = vrot.slane %v163_v62, 2 }
 0x147   :  { %v165_v0 = vadd.f32 %v164_v63, %v163_v62 }
 0x149   :  { %v166_v1 = vrot.slane %v165_v0, 1 }
 0x14b   :  { %v167_v2 = vadd.f32 %v166_v1, %v165_v0 }
 0x14d   :  { %196 = vpush %v167_v2 }
 0x17e   :  { %s197_s1 = spop %196 }
 0x17f   :  { %v177_v4 = vstv %s197_s1 }
 0x180   :  { %v178_v5 = vsel %vm176_vm7, %v177_v4, 0.0 }
 0x181   :  { %180 = vst [vmem:[#allocation5] sm:$0xff] %v178_v5 }
 0x182   :  { %255 = shalt.err (!%p252_p12)
}
 0x183   :  { %s256_s4 = scalar_lea.hbm %s358_s3, 128 }
 0x184   :  { %p257_p13 = scmp.ne.s32.totalorder %s358_s3, %s256_s4  ;;  %p260_p0 = scmp.lt.u32.totalorder %s256_s4, %s358_s3 }
 0x186   :  { %p262_p1 = pnand %p260_p0, %p257_p13 }
 0x188   :  { %265 = shalt.err (!%p262_p1)
}
 0x189   :  { %190 = dma.vmem_to_hbm [thread:$0]  %s188_s27, 128, %s358_s3, [#allocation4]  }
 0x18a   :  { %268 = dma.done.wait [#allocation4], 128  }
 0x18b   :  { %269 = vsyncadd [#allocation4], 4294967168 }
 0x18c   :  { %194 = vsyncpa [#allocation3], 1 }
 0x18d   :  { %195 = vsyncpa [#allocation4], 1 }

</bundles_post_ra>
